<compile_context>
chip_gen: v7x
topology: tpu7x:2x2x1
jax: 0.10.0
libtpu: 0.0.40
codegen_flags: <defaults>
</compile_context>

<pallas_src>
import functools

import jax
import jax.numpy as jnp
from jax import lax
from jax.experimental import pallas as pl
from jax.experimental.pallas import tpu as pltpu


def _cnn3d_kernel(a_ref, w_ref, b_ref, o_ref, *, T, Ho, Wo, PH, PW, kD, pool):
    """Per-batch conv (kD accumulated K=Cin*kH*kW matmuls) + 3-D max pool.

    a_ref : (1, T+2, Ho*Wo, Cin*kH*kW)  bf16  kH/kW-unfolded stride-2 patches
    w_ref : (kD, Cin*kH*kW, Cpad)       bf16  per-depth-tap weight slabs
    b_ref : (1, Cpad)                   f32   bias (zero-padded channels)
    o_ref : (1, T*PH*PW, Cpad)          f32   pooled output (lane-dense)
    """
    M = T * Ho * Wo
    K = a_ref.shape[-1]
    Cp = w_ref.shape[-1]

    # Conv3d as kD = 3 accumulated matmuls with K = 147.  Each lhs is a
    # contiguous depth window of the VMEM block; Ho*Wo = 64 rows per depth
    # slice is sublane-tile aligned, so the reshape is a no-copy relayout.
    # Accumulate in registers (single store at the end, no VMEM RMW).
    acc = None
    for kd in range(kD):
        lhs = a_ref[0, kd:kd + T, :, :].reshape(M, K)
        part = jnp.dot(lhs, w_ref[kd], preferred_element_type=jnp.float32)
        acc = part if acc is None else acc + part

    conv = acc.reshape(T, Ho, Wo, Cp)

    # Spatial 8x8 max-pool (stride 8, no padding -> floor): reshape + axis max.
    hw = conv[:, :PH * pool, :PW * pool, :]
    hw = hw.reshape(T, PH * pool, PW, pool, Cp).max(axis=3)     # pool over W
    hw = hw.reshape(T, PH, pool, PW, Cp).max(axis=2)            # pool over H
    # hw: (T, PH, PW, Cp)

    # Depth max-pool: window 3, stride 1, padding 1 (-inf in torch semantics).
    # Edges are 2-term maxima over static slices -> no -inf fill buffer.
    if T == 1:
        pooled = hw
    elif T == 2:
        first = jnp.maximum(hw[0:1], hw[1:2])
        last = jnp.maximum(hw[T - 2:T - 1], hw[T - 1:T])
        pooled = jnp.concatenate([first, last], axis=0)
    else:
        first = jnp.maximum(hw[0:1], hw[1:2])
        mid = jnp.maximum(jnp.maximum(hw[0:T - 2], hw[1:T - 1]), hw[2:T])
        last = jnp.maximum(hw[T - 2:T - 1], hw[T - 1:T])
        pooled = jnp.concatenate([first, mid, last], axis=0)

    # Bias after pooling: max(x + b) == max(x) + b for a per-channel constant.
    pooled = pooled + b_ref[...].reshape(1, 1, 1, Cp)

    o_ref[...] = pooled.reshape(1, T * PH * PW, Cp).astype(o_ref.dtype)


@functools.partial(jax.jit, static_argnames=("out_channel",))
def cnn3d_forward(image_input, weight, bias, *, out_channel):
    """image_input: (B, T, 3, H, W) f32 -> (B, C_out, T, H_pool, W_pool)."""
    B, T, Cin, H, W = image_input.shape
    kD, kH, kW = 3, 7, 7
    sH = sW = 2
    pD, pHc, pWc = 1, 3, 3
    pool = 8

    Ho = (H + 2 * pHc - kH) // sH + 1
    Wo = (W + 2 * pWc - kW) // sW + 1
    Td = T + 2 * pD
    PH = (Ho - pool) // pool + 1
    PW = (Wo - pool) // pool + 1
    C = out_channel
    Cpad = 128                                    # lane-dense output / MXU N
    K = Cin * kH * kW                             # fused contraction dim (147)

    # ---- wrapper relayout (all fused under jit): bf16 early, kH/kW unfold ---
    x = jnp.transpose(image_input, (0, 2, 1, 3, 4)).astype(jnp.bfloat16)
    xp = jnp.pad(x, ((0, 0), (0, 0), (pD, pD), (pHc, pHc), (pWc, pWc)))
    # Stride-2 H/W unfold: each (kh, kw) tap is a decimated slice -> the kernel
    # sees K = Cin*kH*kW directly (the depth taps stay as in-kernel slices).
    taps = [xp[:, :, :, kh:kh + sH * Ho - 1:sH, kw:kw + sW * Wo - 1:sW]
            for kh in range(kH) for kw in range(kW)]
    A = jnp.stack(taps, axis=-1)                       # (B,Cin,Td,Ho,Wo,kH*kW)
    A = jnp.transpose(A, (0, 2, 3, 4, 1, 5))           # (B,Td,Ho,Wo,Cin,kH*kW)
    A = A.reshape(B, Td, Ho * Wo, K)                   # bf16 patches

    # Weights: (C,Cin,kD,kH,kW) -> (kD, Cin*kH*kW, Cpad); K order (cin,kh,kw)
    # matches the patch layout above; zero-pad C to 128 lanes; bf16 for MXU.
    w_t = jnp.transpose(weight, (2, 1, 3, 4, 0)).reshape(kD, K, C)
    w_t = jnp.pad(w_t, ((0, 0), (0, 0), (0, Cpad - C))).astype(jnp.bfloat16)
    b_t = jnp.pad(bias.astype(jnp.float32), (0, Cpad - C)).reshape(1, Cpad)

    TPW = T * PH * PW
    kernel = functools.partial(_cnn3d_kernel, T=T, Ho=Ho, Wo=Wo, PH=PH, PW=PW,
                               kD=kD, pool=pool)

    out = pl.pallas_call(
        kernel,
        out_shape=jax.ShapeDtypeStruct((B, TPW, Cpad), jnp.float32),
        grid_spec=pltpu.PrefetchScalarGridSpec(
            num_scalar_prefetch=0,
            grid=(B,),
            in_specs=[
                pl.BlockSpec((1, Td, Ho * Wo, K), lambda b: (b, 0, 0, 0)),
                pl.BlockSpec((kD, K, Cpad), lambda b: (0, 0, 0)),
                pl.BlockSpec((1, Cpad), lambda b: (0, 0)),
            ],
            out_specs=pl.BlockSpec((1, TPW, Cpad), lambda b: (b, 0, 0)),
        ),
        compiler_params=pltpu.CompilerParams(
            dimension_semantics=("parallel",),
            vmem_limit_bytes=32 * 1024 * 1024),
    )(A, w_t, b_t)

    # (B, T*PH*PW, Cpad) -> (B, C, T, PH, PW)  (PyTorch NCDHW output)
    out = out.reshape(B, T, PH, PW, Cpad)[..., :C]
    out = jnp.transpose(out, (0, 4, 1, 2, 3))
    # TODO(synk): torch.nn.Dropout is identity at inference; train-mode RNG
    # masking is intentionally not implemented.
    return out


def cnn3d_reference(image_input, weight, bias):
    """Pure-JAX reference (XLA conv + reduce_window) for validation."""
    x = jnp.transpose(image_input, (0, 2, 1, 3, 4))
    conv = lax.conv_general_dilated(
        x, weight, window_strides=(1, 2, 2),
        padding=((1, 1), (3, 3), (3, 3)),
        dimension_numbers=("NCDHW", "OIDHW", "NCDHW"))
    conv = conv + bias.reshape(1, -1, 1, 1, 1)
    pooled = lax.reduce_window(
        conv, -jnp.inf, lax.max,
        window_dimensions=(1, 1, 3, 8, 8),
        window_strides=(1, 1, 1, 8, 8),
        padding=((0, 0), (0, 0), (1, 1), (0, 0), (0, 0)))
    return pooled


if __name__ == "__main__":
    key = jax.random.PRNGKey(0)
    k1, k2, k3 = jax.random.split(key, 3)

    # small shapes consistent with the module: batch=2, seq(T)=4, C_in=3, H=W=16
    B, T, Cin, H, W = 2, 4, 3, 16, 16
    out_channel = 8       # CNN3D(out_channel=8, kernel_size_list=[...], dropout=0.1)

    image_input = jax.random.normal(k1, (B, T, Cin, H, W), dtype=jnp.float32)
    weight = 0.05 * jax.random.normal(k2, (out_channel, Cin, 3, 7, 7), dtype=jnp.float32)
    bias = 0.05 * jax.random.normal(k3, (out_channel,), dtype=jnp.float32)

    out = cnn3d_forward(image_input, weight, bias, out_channel=out_channel)
    out = jax.block_until_ready(out)

    ref = cnn3d_reference(image_input, weight, bias)
    assert out.shape == ref.shape == (B, out_channel, T, 1, 1), (out.shape, ref.shape)
    max_err = float(jnp.max(jnp.abs(out - ref)))
    assert jnp.allclose(out, ref, atol=5e-2, rtol=5e-2), f"max abs err {max_err}"
    print("KERNEL_OK")
</pallas_src>

<mosaic_0001>
module attributes {stable_mosaic.version = 11 : i64} {
  func.func @_cnn3d_kernel(%arg0: i32, %arg1: memref<1x6x64x147xbf16, #tpu.memory_space<vmem>>, %arg2: memref<3x147x128xbf16, #tpu.memory_space<vmem>>, %arg3: memref<1x128xf32, #tpu.memory_space<vmem>>, %arg4: memref<1x4x128xf32, #tpu.memory_space<vmem>>) attributes {dimension_semantics = [#tpu.dimension_semantics<parallel>], iteration_bounds = array<i64: 2>, scalar_prefetch = 0 : i64, scratch_operands = 0 : i64, tpu.core_type = #tpu.core_type<tc>, window_params = [{transform_indices = @transform_0, window_bounds = array<i64: 1, 6, 64, 147>}, {pipeline_mode = #tpu.pipeline_mode<synchronous>, transform_indices = @transform_1, window_bounds = array<i64: 3, 147, 128>}, {pipeline_mode = #tpu.pipeline_mode<synchronous>, transform_indices = @transform_2, window_bounds = array<i64: 1, 128>}, {transform_indices = @transform_3, window_bounds = array<i64: 1, 4, 128>}]} {
    %c0 = arith.constant 0 : index
    %c0_0 = arith.constant 0 : index
    %c0_1 = arith.constant 0 : index
    %c0_2 = arith.constant 0 : index
    %0 = vector.load %arg1[%c0, %c0_0, %c0_1, %c0_2] : memref<1x6x64x147xbf16, #tpu.memory_space<vmem>>, vector<1x4x64x147xbf16>
    %1 = vector.shape_cast %0 : vector<1x4x64x147xbf16> to vector<4x64x147xbf16>
    %2 = vector.shape_cast %1 : vector<4x64x147xbf16> to vector<256x147xbf16>
    %c0_3 = arith.constant 0 : index
    %c0_4 = arith.constant 0 : index
    %c0_5 = arith.constant 0 : index
    %3 = vector.load %arg2[%c0_3, %c0_4, %c0_5] : memref<3x147x128xbf16, #tpu.memory_space<vmem>>, vector<1x147x128xbf16>
    %4 = vector.shape_cast %3 : vector<1x147x128xbf16> to vector<147x128xbf16>
    %cst = arith.constant dense<0.000000e+00> : vector<256x128xf32>
    %5 = tpu.matmul %2, %4, %cst {dimension_numbers = #tpu.dot_dimension_numbers<[1], [0], [0], [1], [0, 0, 1, 1], [], []>} : vector<256x147xbf16>, vector<147x128xbf16>, vector<256x128xf32> -> vector<256x128xf32>
    %c0_6 = arith.constant 0 : index
    %c1 = arith.constant 1 : index
    %c0_7 = arith.constant 0 : index
    %c0_8 = arith.constant 0 : index
    %6 = vector.load %arg1[%c0_6, %c1, %c0_7, %c0_8] : memref<1x6x64x147xbf16, #tpu.memory_space<vmem>>, vector<1x4x64x147xbf16>
    %7 = vector.shape_cast %6 : vector<1x4x64x147xbf16> to vector<4x64x147xbf16>
    %8 = vector.shape_cast %7 : vector<4x64x147xbf16> to vector<256x147xbf16>
    %c1_9 = arith.constant 1 : index
    %c0_10 = arith.constant 0 : index
    %c0_11 = arith.constant 0 : index
    %9 = vector.load %arg2[%c1_9, %c0_10, %c0_11] : memref<3x147x128xbf16, #tpu.memory_space<vmem>>, vector<1x147x128xbf16>
    %10 = vector.shape_cast %9 : vector<1x147x128xbf16> to vector<147x128xbf16>
    %cst_12 = arith.constant dense<0.000000e+00> : vector<256x128xf32>
    %11 = tpu.matmul %8, %10, %cst_12 {dimension_numbers = #tpu.dot_dimension_numbers<[1], [0], [0], [1], [0, 0, 1, 1], [], []>} : vector<256x147xbf16>, vector<147x128xbf16>, vector<256x128xf32> -> vector<256x128xf32>
    %12 = arith.addf %5, %11 : vector<256x128xf32>
    %c0_13 = arith.constant 0 : index
    %c2 = arith.constant 2 : index
    %c0_14 = arith.constant 0 : index
    %c0_15 = arith.constant 0 : index
    %13 = vector.load %arg1[%c0_13, %c2, %c0_14, %c0_15] : memref<1x6x64x147xbf16, #tpu.memory_space<vmem>>, vector<1x4x64x147xbf16>
    %14 = vector.shape_cast %13 : vector<1x4x64x147xbf16> to vector<4x64x147xbf16>
    %15 = vector.shape_cast %14 : vector<4x64x147xbf16> to vector<256x147xbf16>
    %c2_16 = arith.constant 2 : index
    %c0_17 = arith.constant 0 : index
    %c0_18 = arith.constant 0 : index
    %16 = vector.load %arg2[%c2_16, %c0_17, %c0_18] : memref<3x147x128xbf16, #tpu.memory_space<vmem>>, vector<1x147x128xbf16>
    %17 = vector.shape_cast %16 : vector<1x147x128xbf16> to vector<147x128xbf16>
    %cst_19 = arith.constant dense<0.000000e+00> : vector<256x128xf32>
    %18 = tpu.matmul %15, %17, %cst_19 {dimension_numbers = #tpu.dot_dimension_numbers<[1], [0], [0], [1], [0, 0, 1, 1], [], []>} : vector<256x147xbf16>, vector<147x128xbf16>, vector<256x128xf32> -> vector<256x128xf32>
    %19 = arith.addf %12, %18 : vector<256x128xf32>
    %20 = vector.shape_cast %19 : vector<256x128xf32> to vector<4x8x8x128xf32>
    %21 = vector.shape_cast %20 : vector<4x8x8x128xf32> to vector<4x8x1x8x128xf32>
    %cst_20 = arith.constant dense<0xFF800000> : vector<4x8x1x128xf32>
    %22 = vector.multi_reduction <maximumf>, %21, %cst_20 [3] : vector<4x8x1x8x128xf32> to vector<4x8x1x128xf32>
    %23 = vector.shape_cast %22 : vector<4x8x1x128xf32> to vector<4x1x8x1x128xf32>
    %cst_21 = arith.constant dense<0xFF800000> : vector<4x1x1x128xf32>
    %24 = vector.multi_reduction <maximumf>, %23, %cst_21 [2] : vector<4x1x8x1x128xf32> to vector<4x1x1x128xf32>
    %25 = vector.extract_strided_slice %24 {offsets = [0, 0, 0, 0], sizes = [1, 1, 1, 128], strides = [1, 1, 1, 1]} : vector<4x1x1x128xf32> to vector<1x1x1x128xf32>
    %26 = vector.extract_strided_slice %24 {offsets = [1, 0, 0, 0], sizes = [1, 1, 1, 128], strides = [1, 1, 1, 1]} : vector<4x1x1x128xf32> to vector<1x1x1x128xf32>
    %27 = arith.maximumf %25, %26 : vector<1x1x1x128xf32>
    %28 = vector.extract_strided_slice %24 {offsets = [0, 0, 0, 0], sizes = [2, 1, 1, 128], strides = [1, 1, 1, 1]} : vector<4x1x1x128xf32> to vector<2x1x1x128xf32>
    %29 = vector.extract_strided_slice %24 {offsets = [1, 0, 0, 0], sizes = [2, 1, 1, 128], strides = [1, 1, 1, 1]} : vector<4x1x1x128xf32> to vector<2x1x1x128xf32>
    %30 = arith.maximumf %28, %29 : vector<2x1x1x128xf32>
    %31 = vector.extract_strided_slice %24 {offsets = [2, 0, 0, 0], sizes = [2, 1, 1, 128], strides = [1, 1, 1, 1]} : vector<4x1x1x128xf32> to vector<2x1x1x128xf32>
    %32 = arith.maximumf %30, %31 : vector<2x1x1x128xf32>
    %33 = vector.extract_strided_slice %24 {offsets = [2, 0, 0, 0], sizes = [1, 1, 1, 128], strides = [1, 1, 1, 1]} : vector<4x1x1x128xf32> to vector<1x1x1x128xf32>
    %34 = vector.extract_strided_slice %24 {offsets = [3, 0, 0, 0], sizes = [1, 1, 1, 128], strides = [1, 1, 1, 1]} : vector<4x1x1x128xf32> to vector<1x1x1x128xf32>
    %35 = arith.maximumf %33, %34 : vector<1x1x1x128xf32>
    %36 = tpu.concatenate %27, %32, %35 in 0 : vector<1x1x1x128xf32>, vector<2x1x1x128xf32>, vector<1x1x1x128xf32> -> vector<4x1x1x128xf32>
    %c0_22 = arith.constant 0 : index
    %c0_23 = arith.constant 0 : index
    %37 = vector.load %arg3[%c0_22, %c0_23] : memref<1x128xf32, #tpu.memory_space<vmem>>, vector<1x128xf32>
    %38 = vector.shape_cast %37 : vector<1x128xf32> to vector<1x1x1x128xf32>
    %39 = vector.broadcast %38 : vector<1x1x1x128xf32> to vector<4x1x1x128xf32>
    %40 = arith.addf %36, %39 : vector<4x1x1x128xf32>
    %41 = vector.shape_cast %40 : vector<4x1x1x128xf32> to vector<1x4x128xf32>
    %c0_24 = arith.constant 0 : index
    %c0_25 = arith.constant 0 : index
    %c0_26 = arith.constant 0 : index
    %42 = vector.load %arg4[%c0_24, %c0_25, %c0_26] : memref<1x4x128xf32, #tpu.memory_space<vmem>>, vector<1x4x128xf32>
    tpu.vector_store %arg4[%c0_24, %c0_25, %c0_26], %41 {strides = array<i32>} : memref<1x4x128xf32, #tpu.memory_space<vmem>>, vector<1x4x128xf32>,
    return
  }
  func.func @transform_0(%arg0: i32) -> (i32, i32, i32, i32) {
    %c0_i32 = arith.constant 0 : i32
    %c0_i32_0 = arith.constant 0 : i32
    %c0_i32_1 = arith.constant 0 : i32
    %c0_i32_2 = arith.constant 0 : i32
    return %arg0, %c0_i32, %c0_i32_0, %c0_i32_1 : i32, i32, i32, i32
  }
  func.func @transform_1(%arg0: i32) -> (i32, i32, i32) {
    %c0_i32 = arith.constant 0 : i32
    %c0_i32_0 = arith.constant 0 : i32
    %c0_i32_1 = arith.constant 0 : i32
    %c0_i32_2 = arith.constant 0 : i32
    return %c0_i32, %c0_i32_0, %c0_i32_1 : i32, i32, i32
  }
  func.func @transform_2(%arg0: i32) -> (i32, i32) {
    %c0_i32 = arith.constant 0 : i32
    %c0_i32_0 = arith.constant 0 : i32
    %c0_i32_1 = arith.constant 0 : i32
    return %c0_i32, %c0_i32_0 : i32, i32
  }
  func.func @transform_3(%arg0: i32) -> (i32, i32, i32) {
    %c0_i32 = arith.constant 0 : i32
    %c0_i32_0 = arith.constant 0 : i32
    %c0_i32_1 = arith.constant 0 : i32
    return %arg0, %c0_i32, %c0_i32_0 : i32, i32, i32
  }
}

</mosaic_0001>

<bundles_post_ra>
// kernel: cnn3d_forward.1
= control target key start
LH: loop header
LB: loop body
LE: loop exit
PB: predicated region body
PF: predicated region fallthrough
CT: control target
= control target key end

     0   :  { %8 = vsyncpa [#allocation3], 0  ;;  %s3102_s0 = inlined_call_operand.vmem [shape: bf16[2,6,64,147], index: 0, kind: input, shape index: {}]   ;;  %s3103_s1 = inlined_call_operand.vmem [shape: bf16[3,147,128], index: 1, kind: input, shape index: {}]   ;;  %s3104_s2 = inlined_call_operand.vmem [shape: f32[1,128], index: 2, kind: input, shape index: {}]   ;;  %s3105_s3 = inlined_call_operand.hbm [shape: f32[2,4,128], index: 3, kind: output, shape index: {}]  }
   0x1   :  { %10 = vsyncpa [#allocation3 + $0x1], 0  ;;  %s2554_s12 = smov 0   ;;  %s2556_s13 = smov 0  }
   0x2   :  { %s2558_s14 = smov 0   ;;  %s2560_s15 = smov 0  }
   0x3 LB: > { %s2575_s16 = sadd.s32 4294967295, %s2529_s15   ;;  %s1921_s17 = sadd.s32 4294967294, %s2529_s15   ;;  %s2529_s15 = sphi %s2560_s15, %s3111_s15   ;;  %s2525_s14 = sphi %s2558_s14, %s3110_s14   ;;  %s2521_s13 = sphi %s2556_s13, %s3109_s13   ;;  %s2517_s12 = sphi %s2554_s12, %s3108_s12  }
   0x4   : > { %s2579_s18 = sadd.s32 1, %s2529_s15   ;;  %s91_s19 = sadd.s32 1, %s2525_s14 }
   0x5   : > { %s88_s20 = ssub.s32 %s2529_s15, %s2579_s18  ;;  %p101_p0 = scmp.ne.s32.totalorder %s2525_s14, %s2521_s13 }
   0x6   : > { %p89_p1 = scmp.eq.s32.totalorder %s88_s20, 0  ;;  %p102_p2 = scmp.eq.s32.totalorder %s2575_s16, 1 }
   0x7   : > { %p107_p3 = scmp.ne.s32.totalorder %s2521_s13, %s2517_s12  ;;  %p108_p4 = scmp.eq.s32.totalorder %s1921_s17, 1 }
   0x8   : > { %s2590_s21 = scalar_select %p89_p1, %s2525_s14, %s91_s19  }
   0x9   : > { %p2592_p5 = por %p102_p2, %p101_p0  ;;  %p2596_p6 = por %p108_p4, %p107_p3 }
   0xa   : > { %p1924_p7 = scmp.ge.s32.totalorder %s2529_s15, 1  ;;  %p140_p8 = scmp.lt.s32.totalorder %s2529_s15, 3 }
   0xc   : > { %p141_p9 = pnand %p1924_p7, %p140_p8 }
   0xd   : > { %v2365_v0 = vld [vmem:[%s3103_s1 + $0x4c] sm:$0xff] (!%p141_p9)   ;;  %v2531_v1 = vmov (!%p141_p9), 0   ;;  %v2610_v2 = vld [vmem:[%s3103_s1] sm:$0xff] (!%p141_p9)   ;;  %v2367_v3 = vld [vmem:[%s3103_s1 + $0x54] sm:$0xff] (!%p141_p9)   ;;  %p164_p10 = scmp.lt.s32.totalorder (!%p141_p9), %s2575_s16, 1  ;;  %vm475_vm0 = vcmask (!%p141_p9), 154624  }
   0xe   : > { %144 = sbr.rel (%p141_p9) target bundleno = 491 (0x1eb), region = 32  ;;  %531 = vmatprep.subr.bf16.mxu1 (!%p141_p9), %v2531_v1  ;;  %944 = vmatprep.subr.bf16.mxu0 (!%p141_p9), %v2531_v1  ;;  %v2620_v4 = vld [vmem:[%s3103_s1 + $0x8] sm:$0xff] (!%p141_p9)   ;;  %v2369_v5 = vld [vmem:[%s3103_s1 + $0x5c] sm:$0xff] (!%p141_p9)   ;;  %v2632_v6 = vld [vmem:[%s3103_s1 + $0x10] sm:$0xff] (!%p141_p9)   ;;  %vm524_vm1 = vcmask (!%p141_p9), 1040384   ;;  %vm525_vm2 = vcmask (!%p141_p9), 1041408  }
   0xf   : > { %532 = vmatpush1.bf16.msra.mxu1 (!%p141_p9), %v2365_v0  ;;  %945 = vmatpush1.bf16.msra.mxu0 (!%p141_p9), %v2610_v2  ;;  %v2371_v7 = vld [vmem:[%s3103_s1 + $0x64] sm:$0xff] (!%p141_p9)   ;;  %v2644_v8 = vld [vmem:[%s3103_s1 + $0x18] sm:$0xff] (!%p141_p9)   ;;  %v2373_v9 = vld [vmem:[%s3103_s1 + $0x6c] sm:$0xff] (!%p141_p9)   ;;  %v2532_v19 = vmov (!%p141_p9), 65535   ;;  %vm1838_vm3 = vcmask (!%p141_p9), 1041409   ;;  %s161_s11 = sand.u32 (!%p141_p9), 1, %s2521_s13  }
  0x10   : > { %533 = vmatprep.subr.bf16.mxu1 (!%p141_p9), %v2531_v1  ;;  %946 = vmatprep.subr.bf16.mxu0 (!%p141_p9), %v2531_v1  ;;  %v2655_v10 = vld [vmem:[%s3103_s1 + $0x20] sm:$0xff] (!%p141_p9)   ;;  %v2375_v11 = vld [vmem:[%s3103_s1 + $0x74] sm:$0xff] (!%p141_p9)   ;;  %v2671_v12 = vld [vmem:[%s3103_s1 + $0x28] sm:$0xff] (!%p141_p9)   ;;  %v526_v20 = vsel (!%p141_p9), %vm524_vm1, 4294967295, %v2532_v19  ;;  %s1925_s17 = sshll.u32 (!%p141_p9), %s161_s11, 2  ;;  %vm1841_vm4 = vcmask (!%p141_p9), 1042434  }
  0x11   : > { %v2377_v15 = vld [vmem:[%s3103_s1 + $0x7c] sm:$0xff] (!%p141_p9)   ;;  %v2688_v16 = vld [vmem:[%s3103_s1 + $0x30] sm:$0xff] (!%p141_p9)   ;;  %v2379_v17 = vld [vmem:[%s3103_s1 + $0x84] sm:$0xff] (!%p141_p9)   ;;  %v2716_v24 = vsel (!%p141_p9), %vm525_vm2, %v526_v20, 0  ;;  %s2204_s19 = sshll.u32 (!%p141_p9), %s2575_s16, 6  ;;  %vm1844_vm5 = vcmask (!%p141_p9), 1043459  }
  0x12   : > { %v2700_v18 = vld [vmem:[%s3103_s1 + $0x38] sm:$0xff] (!%p141_p9)   ;;  %v2381_v21 = vld [vmem:[%s3103_s1 + $0x8c] sm:$0xff] (!%p141_p9)   ;;  %v2383_v22 = vld [vmem:[%s3103_s1 + $0x94] ss:$0 sps:$4 sm:$0x33] (!%p141_p9)   ;;  %s3060_s27 = scalar_lea.hbm (!%p141_p9), %s3105_s3, %s2204_s19  ;;  %s2533_s29 = smov (!%p141_p9), [#allocation2]  }
  0x13   : > { %534 = vmatpush1.bf16.msra.mxu1 (!%p141_p9), %v2367_v3  ;;  %947 = vmatpush1.bf16.msra.mxu0 (!%p141_p9), %v2620_v4  ;;  %v2712_v23 = vld [vmem:[%s3103_s1 + $0x40] sm:$0xff] (!%p141_p9)   ;;  %v2384_v25 = vld [vmem:[%s3103_s1 + $0x48] ss:$0 sps:$4 sm:$0x33] (!%p141_p9)   ;;  %v529_v26 = vand.u32 (!%p141_p9), %v2383_v22, %v2716_v24  ;;  %v2391_v30 = vld [vmem:[%s3103_s1 + $0x98] sm:$0xff] (!%p141_p9)   ;;  %s2471_s4 = sshll.u32 (!%p141_p9), %s2533_s29, 4  ;;  %s2472_s4 = int_to_ptr.vmem [resolvable:$false] %s2471_s4 }
  0x14   : > { %535 = vmatprep.subr.bf16.mxu1 (!%p141_p9), %v2531_v1  ;;  %948 = vmatprep.subr.bf16.mxu0 (!%p141_p9), %v2531_v1  ;;  %v2726_v27 = vand.u32 (!%p141_p9), %v2384_v25, %v2716_v24  ;;  %v2398_v33 = vld [vmem:[%s3103_s1 + $0xa0] sm:$0xff] (!%p141_p9)   ;;  %v2399_v37 = vld [vmem:[%s3103_s1 + $0xa8] sm:$0xff] (!%p141_p9)   ;;  %v2406_v39 = vld [vmem:[%s3103_s1 + $0xb0] sm:$0xff] (!%p141_p9)   ;;  %s2473_s5 = scalar_lea.vmem (!%p141_p9), %s2472_s4, 128 }
  0x15   : > { %s165_s9 = scalar_select %p164_p10, %s2575_s16, 1  ;;  %v2413_v44 = vld [vmem:[%s3103_s1 + $0xb8] sm:$0xff]   ;;  %v2417_v45 = vld [vmem:[%s3103_s1 + $0xc0] sm:$0xff]   ;;  %v2421_v49 = vld [vmem:[%s3103_s1 + $0xc8] sm:$0xff]  }
  0x16   : > { %v2422_v50 = vld [vmem:[%s3103_s1 + $0xd0] sm:$0xff]   ;;  %v2426_v53 = vld [vmem:[%s3103_s1 + $0xd8] sm:$0xff]   ;;  %v2430_v54 = vld [vmem:[%s3103_s1 + $0xe0] ss:$0 sps:$4 sm:$0x33]   ;;  %s1849_s16 = scalar_lea.sflag [#allocation3], %s161_s11 }
  0x17   : > { %536 = vmatpush1.bf16.msra.mxu1 %v2369_v5  ;;  %949 = vmatpush1.bf16.msra.mxu0 %v2632_v6  ;;  %s2323_s20 = smul.u32 384, %s165_s9  ;;  %v1408_v55 = vand.u32 %v2430_v54, %v2716_v24 }
  0x18   : > { %537 = vmatprep.subr.bf16.mxu1 %v2531_v1  ;;  %950 = vmatprep.subr.bf16.mxu0 %v2531_v1 }
  0x19   : > { %s2661_s30 = scalar_lea.vmem %s3102_s0, %s2323_s20  ;;  %s163_s20 = scalar_lea.vmem [#allocation2], %s1925_s17 }
  0x1a   : > { %v2675_v13 = vld [vmem:[%s2661_s30 + $0x44] ss:$8 sps:$4 sm:$0xff]   ;;  %v2730_v28 = vld [vmem:[%s2661_s30 + $0x40] ss:$8 sps:$4 sm:$0xff]   ;;  %v2739_v31 = vld [vmem:[%s2661_s30 + $0x54] ss:$8 sps:$4 sm:$0xff]  }
  0x1b   : > { %538 = vmatpush1.bf16.msra.mxu1 %v2371_v7  ;;  %951 = vmatpush1.bf16.msra.mxu0 %v2644_v8  ;;  %v2390_v14 = vld [vmem:[%s2661_s30 + $0x4] ss:$8 sps:$4 sm:$0xff]   ;;  %v2388_v29 = vld [vmem:[%s2661_s30] ss:$8 sps:$4 sm:$0xff]   ;;  %v2394_v32 = vld [vmem:[%s2661_s30 + $0x14] ss:$8 sps:$4 sm:$0xff]  }
  0x1c   : > { %539 = vmatprep.subr.bf16.mxu1 %v2531_v1  ;;  %952 = vmatprep.subr.bf16.mxu0 %v2531_v1  ;;  %v2753_v34 = vld [vmem:[%s2661_s30 + $0x50] ss:$8 sps:$4 sm:$0xff]   ;;  %v2759_v36 = vld [vmem:[%s2661_s30 + $0x64] ss:$8 sps:$4 sm:$0xff]   ;;  %v2775_v40 = vld [vmem:[%s2661_s30 + $0x60] ss:$8 sps:$4 sm:$0xff]  }
  0x1d   : > { %2020 = vmatprep.mubr.msk.bf16.mxu1 %vm475_vm0, %v2675_v13  ;;  %2078 = vmatprep.mubr.msk.bf16.mxu0 %vm475_vm0, %v2390_v14  ;;  %v2397_v35 = vld [vmem:[%s2661_s30 + $0x10] ss:$8 sps:$4 sm:$0xff]   ;;  %v2402_v38 = vld [vmem:[%s2661_s30 + $0x24] ss:$8 sps:$4 sm:$0xff]   ;;  %v2405_v41 = vld [vmem:[%s2661_s30 + $0x20] ss:$8 sps:$4 sm:$0xff]  }
  0x1e   : > { %v2782_v42 = vld [vmem:[%s2661_s30 + $0x74] ss:$8 sps:$4 sm:$0xff]   ;;  %v2411_v46 = vld [vmem:[%s2661_s30 + $0x70] ss:$8 sps:$4 sm:$0xff]   ;;  %v2804_v48 = vld [vmem:[%s2661_s30 + $0x84] ss:$8 sps:$4 sm:$0xff]  }
  0x1f   : > { %540 = vmatpush1.bf16.msra.mxu1 %v2373_v9  ;;  %953 = vmatpush1.bf16.msra.mxu0 %v2655_v10  ;;  %v2409_v43 = vld [vmem:[%s2661_s30 + $0x34] ss:$8 sps:$4 sm:$0xff]   ;;  %v2412_v47 = vld [vmem:[%s2661_s30 + $0x30] ss:$8 sps:$4 sm:$0xff]   ;;  %v2822_v51 = vld [vmem:[%s2661_s30 + $0x80] ss:$8 sps:$4 sm:$0xff]  }
  0x20   : > { %541 = vmatprep.subr.bf16.mxu1 %v2531_v1  ;;  %954 = vmatprep.subr.bf16.mxu0 %v2531_v1  ;;  %v2826_v52 = vld [vmem:[%s2661_s30 + $0x94] ss:$8 sps:$4 sm:$0xff]   ;;  %v2847_v56 = vld [vmem:[%s2661_s30 + $0x90] ss:$8 sps:$4 sm:$0xff]   ;;  %v2851_v57 = vld [vmem:[%s2661_s30 + $0xa4] ss:$8 sps:$4 sm:$0xff]  }
  0x21   : > { %v2861_v58 = vld [vmem:[%s2661_s30 + $0xa0] ss:$8 sps:$4 sm:$0xff]   ;;  %v2864_v59 = vld [vmem:[%s2661_s30 + $0xb4] ss:$8 sps:$4 sm:$0xff]   ;;  %v2873_v60 = vld [vmem:[%s2661_s30 + $0xb0] ss:$8 sps:$4 sm:$0xff]  }
  0x22   : > { %v2876_v61 = vld [vmem:[%s2661_s30 + $0xc4] ss:$8 sps:$4 sm:$0xff]   ;;  %v2884_v62 = vld [vmem:[%s2661_s30 + $0xc0] ss:$8 sps:$4 sm:$0xff]   ;;  %v2887_v63 = vld [vmem:[%s2661_s30 + $0xd4] ss:$8 sps:$4 sm:$0xff]  }
  0x23   : > { %542 = vmatpush1.bf16.msra.mxu1 %v2375_v11  ;;  %955 = vmatpush1.bf16.msra.mxu0 %v2671_v12  ;;  %v2896_v0 = vld [vmem:[%s2661_s30 + $0xd0] ss:$8 sps:$4 sm:$0xff]   ;;  %v2911_v3 = vld [vmem:[%s2661_s30 + $0xf4] ss:$8 sps:$4 sm:$0xff]   ;;  %v2443_v5 = vld [vmem:[%s2661_s30 + $0x104] ss:$8 sps:$4 sm:$0xff]  }
  0x24   : > { %543 = vmatprep.subr.bf16.mxu1 %v2531_v1  ;;  %956 = vmatprep.subr.bf16.mxu0 %v2531_v1  ;;  %v2446_v7 = vld [vmem:[%s2661_s30 + $0x114] ss:$8 sps:$4 sm:$0xff]   ;;  %v2449_v9 = vld [vmem:[%s2661_s30 + $0x124] ss:$8 sps:$4 sm:$0xff]   ;;  %v2457_v14 = vld [vmem:[%s2661_s30 + $0x140] ss:$8 sps:$4 sm:$0xff]  }
  0x25   : > { %v2452_v11 = vld [vmem:[%s2661_s30 + $0x134] ss:$8 sps:$4 sm:$0xff]   ;;  %v2466_v20 = vld [vmem:[%s2661_s30 + $0x170] ss:$8 sps:$4 sm:$0xff]   ;;  %s1862_s24 = sshll.u32 %s163_s20, 4  ;;  %s3062_s24 = int_to_ptr.vmem [resolvable:$true] %s1862_s24 }
  0x26   : > { %v2464_v19 = vld [vmem:[%s2661_s30 + $0x174] ss:$8 sps:$4 sm:$0xff]   ;;  %s2467_s28 = scalar_lea.vmem %s3062_s24, 64  ;;  %p2474_p0 = scmp.lt.s32.totalorder %s3062_s24, %s2472_s4 }
  0x27   : > { %544 = vmatpush1.bf16.msra.mxu1 %v2377_v15  ;;  %957 = vmatpush1.bf16.msra.mxu0 %v2688_v16  ;;  %v2458_v15 = vld [vmem:[%s2661_s30 + $0x154] ss:$8 sps:$4 sm:$0xff]   ;;  %p2468_p11 = scmp.ne.s32.totalorder %s3062_s24, %s2467_s28  ;;  %p2475_p1 = scmp.lt.s32.totalorder %s2473_s5, %s2467_s28 }
  0x28   : > { %545 = vmatprep.subr.bf16.mxu1 %v2531_v1  ;;  %958 = vmatprep.subr.bf16.mxu0 %v2531_v1 }
  0x29   : > { %p2469_p12 = pnand %p2468_p11, %p2592_p5  ;;  %p2476_p2 = por %p2475_p1, %p2474_p0 }
  0x2b   : > { %546 = vmatpush1.bf16.msra.mxu1 %v2379_v17  ;;  %959 = vmatpush1.bf16.msra.mxu0 %v2700_v18  ;;  %v2461_v17 = vld [vmem:[%s2661_s30 + $0x164] ss:$8 sps:$4 sm:$0xff]   ;;  %p2470_p13 = pneg %p2469_p12 }
  0x2c   : > { %547 = vmatprep.subr.bf16.mxu1 %v2531_v1  ;;  %960 = vmatprep.subr.bf16.mxu0 %v2531_v1 }
  0x2d   : > { %p2477_p3 = pnand %p2476_p2, %p2470_p13 }
  0x2f   : > { %548 = vmatpush1.bf16.msra.mxu1 %v2381_v21  ;;  %961 = vmatpush1.bf16.msra.mxu0 %v2712_v23 }
  0x30   : > { %549 = vmatprep.subr.bf16.mxu1 %v2531_v1  ;;  %962 = vmatprep.subr.bf16.mxu0 %v2531_v1 }
  0x33   : > { %550 = vmatpush1.bf16.msra.mxu1 %v529_v26  ;;  %963 = vmatpush1.bf16.msra.mxu0 %v2726_v27 }
  0x34   : > { %2207 = vmatprep.subr.bf16.mxu1 %v2531_v1  ;;  %1410 = vmatprep.subr.bf16.mxu0 %v2531_v1 }
  0x36   : > { %564 = vmatmul.mubr.bf16.vlgmr.msra.gmra.mrb[0].mxu1 %v2730_v28  ;;  %977 = vmatmul.mubr.bf16.vlgmr.msra.gmra.mrb[0].mxu0 %v2388_v29 }
  0x37   : > { %2217 = vmatpush1.bf16.msra.mxu1 %v2610_v2  ;;  %1411 = vmatpush1.bf16.msra.mxu0 %v2391_v30  ;;  %v2908_v2 = vld [vmem:[%s2661_s30 + $0xe0] ss:$8 sps:$4 sm:$0xff]  }
  0x38   : > { %2021 = vmatprep.mubr.msk.bf16.mxu1 %vm475_vm0, %v2739_v31  ;;  %2079 = vmatprep.mubr.msk.bf16.mxu0 %vm475_vm0, %v2394_v32 }
  0x39   : > { %1412 = vmatprep.subr.bf16.mxu0 %v2531_v1  ;;  %2208 = vmatprep.subr.bf16.mxu1 %v2531_v1 }
  0x3b   : > { %2218 = vmatpush1.bf16.msra.mxu1 %v2620_v4  ;;  %1413 = vmatpush1.bf16.msra.mxu0 %v2398_v33  ;;  %v2920_v4 = vld [vmem:[%s2661_s30 + $0xf0] ss:$8 sps:$4 sm:$0xff]  }
  0x3c   : > { %2209 = vmatprep.subr.bf16.mxu1 %v2531_v1  ;;  %1414 = vmatprep.subr.bf16.mxu0 %v2531_v1 }
  0x3e   : > { %572 = vmatmul.mubr.bf16.gmra.mrb[4].mxu1 %v2753_v34  ;;  %985 = vmatmul.mubr.bf16.gmra.mrb[4].mxu0 %v2397_v35 }
  0x3f   : > { %2022 = vmatprep.mubr.msk.bf16.mxu1 %vm475_vm0, %v2759_v36  ;;  %1415 = vmatpush1.bf16.msra.mxu0 %v2399_v37 }
  0x40   : > { %2080 = vmatprep.mubr.msk.bf16.mxu0 %vm475_vm0, %v2402_v38  ;;  %1416 = vmatprep.subr.bf16.mxu0 %v2531_v1 }
  0x41   : > { %2219 = vmatpush1.bf16.msra.mxu1 %v2632_v6  ;;  %v2445_v6 = vld [vmem:[%s2661_s30 + $0x100] ss:$8 sps:$4 sm:$0xff]  }
  0x42   : > { %2210 = vmatprep.subr.bf16.mxu1 %v2531_v1 }
  0x43   : > { %1417 = vmatpush1.bf16.msra.mxu0 %v2406_v39 }
  0x44   : > { %1418 = vmatprep.subr.bf16.mxu0 %v2531_v1 }
  0x45   : > { %2220 = vmatpush1.bf16.msra.mxu1 %v2644_v8  ;;  %v2448_v8 = vld [vmem:[%s2661_s30 + $0x110] ss:$8 sps:$4 sm:$0xff]  }
  0x46   : > { %580 = vmatmul.mubr.bf16.gmra.mrb[8].mxu1 %v2775_v40  ;;  %2211 = vmatprep.subr.bf16.mxu1 %v2531_v1 }
  0x47   : > { %993 = vmatmul.mubr.bf16.gmra.mrb[8].mxu0 %v2405_v41  ;;  %2023 = vmatprep.mubr.msk.bf16.mxu1 %vm475_vm0, %v2782_v42 }
  0x48   : > { %2081 = vmatprep.mubr.msk.bf16.mxu0 %vm475_vm0, %v2409_v43  ;;  %1419 = vmatpush1.bf16.msra.mxu0 %v2413_v44 }
  0x49   : > { %1420 = vmatprep.subr.bf16.mxu0 %v2531_v1  ;;  %2221 = vmatpush1.bf16.msra.mxu1 %v2655_v10  ;;  %v2451_v10 = vld [vmem:[%s2661_s30 + $0x120] ss:$8 sps:$4 sm:$0xff]  }
  0x4a   : > { %2212 = vmatprep.subr.bf16.mxu1 %v2531_v1 }
  0x4c   : > { %1421 = vmatpush1.bf16.msra.mxu0 %v2417_v45 }
  0x4d   : > { %1422 = vmatprep.subr.bf16.mxu0 %v2531_v1  ;;  %2222 = vmatpush1.bf16.msra.mxu1 %v2671_v12  ;;  %v2454_v12 = vld [vmem:[%s2661_s30 + $0x130] ss:$8 sps:$4 sm:$0xff]  }
  0x4e   : > { %588 = vmatmul.mubr.bf16.gmra.mrb[12].mxu1 %v2411_v46  ;;  %2213 = vmatprep.subr.bf16.mxu1 %v2531_v1 }
  0x4f   : > { %1001 = vmatmul.mubr.bf16.gmra.mrb[12].mxu0 %v2412_v47  ;;  %2024 = vmatprep.mubr.msk.bf16.mxu1 %vm475_vm0, %v2804_v48 }
  0x50   : > { %2082 = vmatprep.mubr.msk.bf16.mxu0 %vm475_vm0, %v2675_v13  ;;  %1423 = vmatpush1.bf16.msra.mxu0 %v2421_v49  ;;  %v2455_v13 = vld [vmem:[%s2661_s30 + $0x144] ss:$8 sps:$4 sm:$0xff]  }
  0x51   : > { %1424 = vmatprep.subr.bf16.mxu0 %v2531_v1  ;;  %2223 = vmatpush1.bf16.msra.mxu1 %v2688_v16  ;;  %v2460_v16 = vld [vmem:[%s2661_s30 + $0x150] ss:$8 sps:$4 sm:$0xff]  }
  0x52   : > { %2214 = vmatprep.subr.bf16.mxu1 %v2531_v1 }
  0x54   : > { %1425 = vmatpush1.bf16.msra.mxu0 %v2422_v50 }
  0x55   : > { %1426 = vmatprep.subr.bf16.mxu0 %v2531_v1  ;;  %2224 = vmatpush1.bf16.msra.mxu1 %v2700_v18  ;;  %v2463_v18 = vld [vmem:[%s2661_s30 + $0x160] ss:$8 sps:$4 sm:$0xff]  }
  0x56   : > { %596 = vmatmul.mubr.bf16.gmra.mrb[16].mxu1 %v2822_v51  ;;  %2215 = vmatprep.subr.bf16.mxu1 %v2531_v1 }
  0x57   : > { %1009 = vmatmul.mubr.bf16.gmra.mrb[16].mxu0 %v2730_v28  ;;  %2025 = vmatprep.mubr.msk.bf16.mxu1 %vm475_vm0, %v2826_v52 }
  0x58   : > { %2083 = vmatprep.mubr.msk.bf16.mxu0 %vm475_vm0, %v2739_v31  ;;  %1427 = vmatpush1.bf16.msra.mxu0 %v2426_v53 }
  0x59   : > { %1428 = vmatprep.subr.bf16.mxu0 %v2531_v1  ;;  %2225 = vmatpush1.bf16.msra.mxu1 %v2712_v23 }
  0x5a   : > { %2216 = vmatprep.subr.bf16.mxu1 %v2531_v1  ;;  %v2899_v1 = vld [vmem:[%s2661_s30 + $0xe4] ss:$8 sps:$4 sm:$0xff]  }
  0x5c   : > { %1429 = vmatpush1.bf16.msra.mxu0 %v1408_v55 }
  0x5d   : > { %2226 = vmatpush1.bf16.msra.mxu1 %v2726_v27 }
  0x5e   : > { %604 = vmatmul.mubr.bf16.gmra.mrb[20].mxu1 %v2847_v56 }
  0x5f   : > { %1017 = vmatmul.mubr.bf16.gmra.mrb[20].mxu0 %v2753_v34  ;;  %2026 = vmatprep.mubr.msk.bf16.mxu1 %vm475_vm0, %v2851_v57 }
  0x60   : > { %2084 = vmatprep.mubr.msk.bf16.mxu0 %vm475_vm0, %v2759_v36 }
  0x66   : > { %612 = vmatmul.mubr.bf16.gmra.mrb[24].mxu1 %v2861_v58 }
  0x67   : > { %1025 = vmatmul.mubr.bf16.gmra.mrb[24].mxu0 %v2775_v40  ;;  %2027 = vmatprep.mubr.msk.bf16.mxu1 %vm475_vm0, %v2864_v59 }
  0x68   : > { %2085 = vmatprep.mubr.msk.bf16.mxu0 %vm475_vm0, %v2782_v42 }
  0x6e   : > { %620 = vmatmul.mubr.bf16.gmra.mrb[28].mxu1 %v2873_v60 }
  0x6f   : > { %1033 = vmatmul.mubr.bf16.gmra.mrb[28].mxu0 %v2411_v46  ;;  %2028 = vmatprep.mubr.msk.bf16.mxu1 %vm475_vm0, %v2876_v61 }
  0x70   : > { %2187 = vmatprep.mubr.msk.bf16.mxu0 %vm475_vm0, %v2804_v48 }
  0x76   : > { %628 = vmatmul.mubr.bf16.gmra.mrb[32].mxu1 %v2884_v62 }
  0x77   : > { %1443 = vmatmul.mubr.bf16.vlgmr.msra.gmra.mrb[0].mxu0 %v2822_v51  ;;  %2029 = vmatprep.mubr.msk.bf16.mxu1 %vm475_vm0, %v2887_v63 }
  0x78   : > { %2188 = vmatprep.mubr.msk.bf16.mxu0 %vm475_vm0, %v2826_v52 }
  0x7e   : > { %636 = vmatmul.mubr.bf16.gmra.mrb[36].mxu1 %v2896_v0 }
  0x7f   : > { %1451 = vmatmul.mubr.bf16.gmra.mrb[4].mxu0 %v2847_v56  ;;  %2030 = vmatprep.mubr.msk.bf16.mxu1 %vm475_vm0, %v2899_v1 }
  0x80   : > { %2189 = vmatprep.mubr.msk.bf16.mxu0 %vm475_vm0, %v2851_v57 }
  0x86   : > { %644 = vmatmul.mubr.bf16.gmra.mrb[40].mxu1 %v2908_v2 }
  0x87   : > { %1459 = vmatmul.mubr.bf16.gmra.mrb[8].mxu0 %v2861_v58  ;;  %2031 = vmatprep.mubr.msk.bf16.mxu1 %vm475_vm0, %v2911_v3 }
  0x88   : > { %2190 = vmatprep.mubr.msk.bf16.mxu0 %vm475_vm0, %v2864_v59 }
  0x8e   : > { %652 = vmatmul.mubr.bf16.gmra.mrb[44].mxu1 %v2920_v4 }
  0x8f   : > { %1467 = vmatmul.mubr.bf16.gmra.mrb[12].mxu0 %v2873_v60  ;;  %2032 = vmatprep.mubr.msk.bf16.mxu1 %vm475_vm0, %v2443_v5 }
  0x90   : > { %2191 = vmatprep.mubr.msk.bf16.mxu0 %vm475_vm0, %v2876_v61 }
  0x96   : > { %660 = vmatmul.mubr.bf16.gmra.mrb[48].mxu1 %v2445_v6 }
  0x97   : > { %1475 = vmatmul.mubr.bf16.gmra.mrb[16].mxu0 %v2884_v62  ;;  %2033 = vmatprep.mubr.msk.bf16.mxu1 %vm475_vm0, %v2446_v7 }
  0x98   : > { %2192 = vmatprep.mubr.msk.bf16.mxu0 %vm475_vm0, %v2887_v63 }
  0x9e   : > { %668 = vmatmul.mubr.bf16.gmra.mrb[52].mxu1 %v2448_v8 }
  0x9f   : > { %1483 = vmatmul.mubr.bf16.gmra.mrb[20].mxu0 %v2896_v0  ;;  %2034 = vmatprep.mubr.msk.bf16.mxu1 %vm475_vm0, %v2449_v9 }
  0xa0   : > { %2193 = vmatprep.mubr.msk.bf16.mxu0 %vm475_vm0, %v2899_v1 }
  0xa6   : > { %676 = vmatmul.mubr.bf16.gmra.mrb[56].mxu1 %v2451_v10 }
  0xa7   : > { %1491 = vmatmul.mubr.bf16.gmra.mrb[24].mxu0 %v2908_v2  ;;  %2035 = vmatprep.mubr.msk.bf16.mxu1 %vm475_vm0, %v2452_v11 }
  0xa8   : > { %2194 = vmatprep.mubr.msk.bf16.mxu0 %vm475_vm0, %v2911_v3 }
  0xae   : > { %684 = vmatmul.mubr.bf16.gmra.mrb[60].mxu1 %v2454_v12 }
  0xaf   : > { %1499 = vmatmul.mubr.bf16.gmra.mrb[28].mxu0 %v2920_v4  ;;  %2086 = vmatprep.mubr.msk.bf16.mxu1 %vm475_vm0, %v2804_v48 }
  0xb0   : > { %2195 = vmatprep.mubr.msk.bf16.mxu0 %vm475_vm0, %v2443_v5 }
  0xb6   : > { %1041 = vmatmul.mubr.bf16.vlgmr.msra.gmra.mrb[32].mxu1 %v2822_v51 }
  0xb7   : > { %1507 = vmatmul.mubr.bf16.gmra.mrb[32].mxu0 %v2445_v6  ;;  %2087 = vmatprep.mubr.msk.bf16.mxu1 %vm475_vm0, %v2826_v52 }
  0xb8   : > { %2196 = vmatprep.mubr.msk.bf16.mxu0 %vm475_vm0, %v2446_v7 }
  0xbe   : > { %1049 = vmatmul.mubr.bf16.gmra.mrb[36].mxu1 %v2847_v56 }
  0xbf   : > { %1515 = vmatmul.mubr.bf16.gmra.mrb[36].mxu0 %v2448_v8  ;;  %2088 = vmatprep.mubr.msk.bf16.mxu1 %vm475_vm0, %v2851_v57 }
  0xc0   : > { %2197 = vmatprep.mubr.msk.bf16.mxu0 %vm475_vm0, %v2449_v9 }
  0xc6   : > { %1057 = vmatmul.mubr.bf16.gmra.mrb[40].mxu1 %v2861_v58 }
  0xc7   : > { %1523 = vmatmul.mubr.bf16.gmra.mrb[40].mxu0 %v2451_v10  ;;  %2089 = vmatprep.mubr.msk.bf16.mxu1 %vm475_vm0, %v2864_v59 }
  0xc8   : > { %2198 = vmatprep.mubr.msk.bf16.mxu0 %vm475_vm0, %v2452_v11 }
  0xce   : > { %1065 = vmatmul.mubr.bf16.gmra.mrb[44].mxu1 %v2873_v60 }
  0xcf   : > { %1531 = vmatmul.mubr.bf16.gmra.mrb[44].mxu0 %v2454_v12  ;;  %2090 = vmatprep.mubr.msk.bf16.mxu1 %vm475_vm0, %v2876_v61 }
  0xd0   : > { %2199 = vmatprep.mubr.msk.bf16.mxu0 %vm475_vm0, %v2455_v13 }
  0xd6   : > { %1073 = vmatmul.mubr.bf16.gmra.mrb[48].mxu1 %v2884_v62 }
  0xd7   : > { %1539 = vmatmul.mubr.bf16.gmra.mrb[48].mxu0 %v2457_v14  ;;  %2091 = vmatprep.mubr.msk.bf16.mxu1 %vm475_vm0, %v2887_v63 }
  0xd8   : > { %2200 = vmatprep.mubr.msk.bf16.mxu0 %vm475_vm0, %v2458_v15 }
  0xde   : > { %1081 = vmatmul.mubr.bf16.gmra.mrb[52].mxu1 %v2896_v0 }
  0xdf   : > { %1547 = vmatmul.mubr.bf16.gmra.mrb[52].mxu0 %v2460_v16  ;;  %2092 = vmatprep.mubr.msk.bf16.mxu1 %vm475_vm0, %v2899_v1 }
  0xe0   : > { %2201 = vmatprep.mubr.msk.bf16.mxu0 %vm475_vm0, %v2461_v17 }
  0xe6   : > { %1089 = vmatmul.mubr.bf16.gmra.mrb[56].mxu1 %v2908_v2 }
  0xe7   : > { %1555 = vmatmul.mubr.bf16.gmra.mrb[56].mxu0 %v2463_v18  ;;  %2093 = vmatprep.mubr.msk.bf16.mxu1 %vm475_vm0, %v2911_v3 }
  0xe8   : > { %2202 = vmatprep.mubr.msk.bf16.mxu0 %vm475_vm0, %v2464_v19 }
  0xee   : > { %1097 = vmatmul.mubr.bf16.gmra.mrb[60].mxu1 %v2920_v4 }
  0xef   : > { %1563 = vmatmul.mubr.bf16.gmra.mrb[60].mxu0 %v2466_v20 }
 0x109   : > { %v565_v21 = vpop.f32.mrb[0].mxu1 }
 0x10a   : > { %v567_v22 = vpop.f32.mrb[1].mxu1 }
 0x10b   : > { %v568_v23 = vpop.f32.mrb[2].mxu1 }
 0x10c   : > { %v570_v24 = vpop.f32.mrb[3].mxu1 }
 0x111   : > { %v573_v25 = vpop.f32.mrb[4].mxu1 }
 0x112   : > { %v575_v26 = vpop.f32.mrb[5].mxu1 }
 0x113   : > { %v576_v27 = vpop.f32.mrb[6].mxu1 }
 0x114   : > { %v578_v28 = vpop.f32.mrb[7].mxu1 }
 0x119   : > { %v581_v29 = vpop.f32.mrb[8].mxu1 }
 0x11a   : > { %v583_v30 = vpop.f32.mrb[9].mxu1 }
 0x11b   : > { %v584_v31 = vpop.f32.mrb[10].mxu1 }
 0x11c   : > { %v586_v32 = vpop.f32.mrb[11].mxu1 }
 0x121   : > { %v2988_v33 = vpop.f32.mrb[12].mxu1 }
 0x122   : > { %v591_v34 = vpop.f32.mrb[13].mxu1 }
 0x123   : > { %v2990_v35 = vpop.f32.mrb[14].mxu1 }
 0x124   : > { %v594_v36 = vpop.f32.mrb[15].mxu1 }
 0x129   : > { %v2992_v37 = vpop.f32.mrb[16].mxu1 }
 0x12a   : > { %v599_v38 = vpop.f32.mrb[17].mxu1 }
 0x12b   : > { %v2994_v39 = vpop.f32.mrb[18].mxu1 }
 0x12c   : > { %v602_v40 = vpop.f32.mrb[19].mxu1 }
 0x131   : > { %v2996_v41 = vpop.f32.mrb[20].mxu1 }
 0x132   : > { %v607_v42 = vpop.f32.mrb[21].mxu1 }
 0x133   : > { %v2998_v43 = vpop.f32.mrb[22].mxu1 }
 0x134   : > { %v610_v44 = vpop.f32.mrb[23].mxu1 }
 0x139   : > { %v3000_v45 = vpop.f32.mrb[24].mxu1 }
 0x13a   : > { %v615_v46 = vpop.f32.mrb[25].mxu1 }
 0x13b   : > { %v3002_v47 = vpop.f32.mrb[26].mxu1 }
 0x13c   : > { %v618_v48 = vpop.f32.mrb[27].mxu1 }
 0x141   : > { %v3004_v49 = vpop.f32.mrb[28].mxu1 }
 0x142   : > { %v623_v50 = vpop.f32.mrb[29].mxu1 }
 0x143   : > { %v3006_v51 = vpop.f32.mrb[30].mxu1 }
 0x144   : > { %v626_v52 = vpop.f32.mrb[31].mxu1 }
 0x14a   : > { %v1444_v53 = vpop.f32.mrb[0].mxu0 }
 0x14b   : > { %v2227_v54 = vadd.f32 %v1444_v53, %v565_v21  ;;  %v1446_v55 = vpop.f32.mrb[1].mxu0 }
 0x14c   : > { %v1447_v56 = vpop.f32.mrb[2].mxu0 }
 0x14d   : > { %v1603_v57 = vrot.slane %v2227_v54, 4  ;;  %v2228_v58 = vadd.f32 %v1447_v56, %v568_v23  ;;  %v1449_v59 = vpop.f32.mrb[3].mxu0 }
 0x14f   : > { %v1604_v60 = vmax.f32 %v2227_v54, %v1603_v57  ;;  %v1609_v61 = vrot.slane %v2228_v58, 4 }
 0x151   : > { %v1605_v62 = vrot.slane %v1604_v60, 2  ;;  %v1610_v63 = vmax.f32 %v2228_v58, %v1609_v61 }
 0x152   : > { %v1452_v0 = vpop.f32.mrb[4].mxu0 }
 0x153   : > { %v1606_v1 = vmax.f32 %v1604_v60, %v1605_v62  ;;  %v1611_v2 = vrot.slane %v1610_v63, 2  ;;  %v2229_v3 = vadd.f32 %v1452_v0, %v573_v25  ;;  %v1454_v4 = vpop.f32.mrb[5].mxu0 }
 0x154   : > { %v1455_v5 = vpop.f32.mrb[6].mxu0 }
 0x155   : > { %v1607_v6 = vrot.slane %v1606_v1, 1  ;;  %v1612_v7 = vmax.f32 %v1610_v63, %v1611_v2  ;;  %v1615_v8 = vrot.slane %v2229_v3, 4  ;;  %v2230_v9 = vadd.f32 %v1455_v5, %v576_v27  ;;  %v1457_v10 = vpop.f32.mrb[7].mxu0 }
 0x157   : > { %v1613_v11 = vrot.slane %v1612_v7, 1  ;;  %v1616_v12 = vmax.f32 %v2229_v3, %v1615_v8  ;;  %v1621_v13 = vrot.slane %v2230_v9, 4  ;;  %v1608_v14 = vmax.f32 %v1606_v1, %v1607_v6 }
 0x159   : > { %v1614_v15 = vmax.f32 %v1612_v7, %v1613_v11  ;;  %v1617_v16 = vrot.slane %v1616_v12, 2  ;;  %v1622_v17 = vmax.f32 %v2230_v9, %v1621_v13 }
 0x15a   : > { %v1460_v18 = vpop.f32.mrb[8].mxu0 }
 0x15b   : > { %v1795_v19 = vmax.f32 %v1608_v14, %v1614_v15  ;;  %v1618_v20 = vmax.f32 %v1616_v12, %v1617_v16  ;;  %v1623_v21 = vrot.slane %v1622_v17, 2  ;;  %v2231_v22 = vadd.f32 %v1460_v18, %v581_v29  ;;  %v1462_v23 = vpop.f32.mrb[9].mxu0 }
 0x15c   : > { %v1463_v24 = vpop.f32.mrb[10].mxu0 }
 0x15d   : > { %v1619_v25 = vrot.slane %v1618_v20, 1  ;;  %v1624_v26 = vmax.f32 %v1622_v17, %v1623_v21  ;;  %v1627_v28 = vrot.slane %v2231_v22, 4  ;;  %v2232_v30 = vadd.f32 %v1463_v24, %v584_v31  ;;  %v1465_v27 = vpop.f32.mrb[11].mxu0 }
 0x15f   : > { %v1620_v32 = vmax.f32 %v1618_v20, %v1619_v25  ;;  %v1625_v34 = vrot.slane %v1624_v26, 1  ;;  %v1628_v36 = vmax.f32 %v2231_v22, %v1627_v28  ;;  %v1633_v38 = vrot.slane %v2232_v30, 4 }
 0x161   : > { %v1796_v40 = vmax.f32 %v1795_v19, %v1620_v32  ;;  %v1626_v42 = vmax.f32 %v1624_v26, %v1625_v34  ;;  %v1629_v44 = vrot.slane %v1628_v36, 2  ;;  %v1634_v46 = vmax.f32 %v2232_v30, %v1633_v38 }
 0x162   : > { %v1468_v48 = vpop.f32.mrb[12].mxu0 }
 0x163   : > { %v1797_v50 = vmax.f32 %v1796_v40, %v1626_v42  ;;  %v1630_v52 = vmax.f32 %v1628_v36, %v1629_v44  ;;  %v1635_v53 = vrot.slane %v1634_v46, 2  ;;  %v2233_v29 = vadd.f32 %v1468_v48, %v2988_v33  ;;  %v1470_v54 = vpop.f32.mrb[13].mxu0 }
 0x164   : > { %v1471_v55 = vpop.f32.mrb[14].mxu0 }
 0x165   : > { %v1631_v56 = vrot.slane %v1630_v52, 1  ;;  %v1636_v57 = vmax.f32 %v1634_v46, %v1635_v53  ;;  %v1639_v31 = vrot.slane %v2233_v29, 4  ;;  %v2234_v58 = vadd.f32 %v1471_v55, %v2990_v35  ;;  %v1473_v59 = vpop.f32.mrb[15].mxu0 }
 0x167   : > { %v1632_v60 = vmax.f32 %v1630_v52, %v1631_v56  ;;  %v1637_v61 = vrot.slane %v1636_v57, 1  ;;  %v1640_v62 = vmax.f32 %v2233_v29, %v1639_v31  ;;  %v1645_v63 = vrot.slane %v2234_v58, 4 }
 0x169   : > { %v1798_v0 = vmax.f32 %v1797_v50, %v1632_v60  ;;  %v1638_v1 = vmax.f32 %v1636_v57, %v1637_v61  ;;  %v1641_v2 = vrot.slane %v1640_v62, 2  ;;  %v1646_v3 = vmax.f32 %v2234_v58, %v1645_v63 }
 0x16a   : > { %v1476_v4 = vpop.f32.mrb[16].mxu0 }
 0x16b   : > { %v1799_v5 = vmax.f32 %v1798_v0, %v1638_v1  ;;  %v1642_v6 = vmax.f32 %v1640_v62, %v1641_v2  ;;  %v1647_v33 = vrot.slane %v1646_v3, 2  ;;  %v2235_v7 = vadd.f32 %v1476_v4, %v2992_v37  ;;  %v1478_v8 = vpop.f32.mrb[17].mxu0 }
 0x16c   : > { %v1479_v9 = vpop.f32.mrb[18].mxu0 }
 0x16d   : > { %v1643_v10 = vrot.slane %v1642_v6, 1  ;;  %v1648_v11 = vmax.f32 %v1646_v3, %v1647_v33  ;;  %v1651_v35 = vrot.slane %v2235_v7, 4  ;;  %v2236_v12 = vadd.f32 %v1479_v9, %v2994_v39  ;;  %v1481_v13 = vpop.f32.mrb[19].mxu0 }
 0x16f   : > { %v1644_v14 = vmax.f32 %v1642_v6, %v1643_v10  ;;  %v1649_v15 = vrot.slane %v1648_v11, 1  ;;  %v1652_v16 = vmax.f32 %v2235_v7, %v1651_v35  ;;  %v1657_v17 = vrot.slane %v2236_v12, 4 }
 0x171   : > { %v3012_v18 = vmax.f32 %v1799_v5, %v1644_v14  ;;  %v3014_v19 = vmax.f32 %v1648_v11, %v1649_v15  ;;  %v1653_v20 = vrot.slane %v1652_v16, 2  ;;  %v1658_v21 = vmax.f32 %v2236_v12, %v1657_v17 }
 0x172   : > { %v1484_v22 = vpop.f32.mrb[20].mxu0 }
 0x173   : > { %v1801_v37 = vmax.f32 %v3012_v18, %v3014_v19  ;;  %v1654_v23 = vmax.f32 %v1652_v16, %v1653_v20  ;;  %v1659_v24 = vrot.slane %v1658_v21, 2  ;;  %v2237_v25 = vadd.f32 %v1484_v22, %v2996_v41  ;;  %v1486_v39 = vpop.f32.mrb[21].mxu0 }
 0x174   : > { %v1487_v26 = vpop.f32.mrb[22].mxu0 }
 0x175   : > { %v1655_v28 = vrot.slane %v1654_v23, 1  ;;  %v1660_v30 = vmax.f32 %v1658_v21, %v1659_v24  ;;  %v1663_v27 = vrot.slane %v2237_v25, 4  ;;  %v2238_v32 = vadd.f32 %v1487_v26, %v2998_v43  ;;  %v1489_v34 = vpop.f32.mrb[23].mxu0 }
 0x177   : > { %v1661_v36 = vrot.slane %v1660_v30, 1  ;;  %v1664_v38 = vmax.f32 %v2237_v25, %v1663_v27  ;;  %v1669_v40 = vrot.slane %v2238_v32, 4  ;;  %v1656_v42 = vmax.f32 %v1654_v23, %v1655_v28 }
 0x179   : > { %v1662_v44 = vmax.f32 %v1660_v30, %v1661_v36  ;;  %v1665_v46 = vrot.slane %v1664_v38, 2  ;;  %v1670_v48 = vmax.f32 %v2238_v32, %v1669_v40 }
 0x17a   : > { %v1492_v50 = vpop.f32.mrb[24].mxu0 }
 0x17b   : > { %v1802_v52 = vmax.f32 %v1656_v42, %v1662_v44  ;;  %v1666_v53 = vmax.f32 %v1664_v38, %v1665_v46  ;;  %v1671_v29 = vrot.slane %v1670_v48, 2  ;;  %v2239_v41 = vadd.f32 %v1492_v50, %v3000_v45  ;;  %v1494_v54 = vpop.f32.mrb[25].mxu0 }
 0x17c   : > { %v1495_v55 = vpop.f32.mrb[26].mxu0 }
 0x17d   : > { %v1667_v56 = vrot.slane %v1666_v53, 1  ;;  %v1672_v57 = vmax.f32 %v1670_v48, %v1671_v29  ;;  %v1675_v31 = vrot.slane %v2239_v41, 4  ;;  %v2240_v43 = vadd.f32 %v1495_v55, %v3002_v47  ;;  %v1497_v58 = vpop.f32.mrb[27].mxu0 }
 0x17f   : > { %v1668_v59 = vmax.f32 %v1666_v53, %v1667_v56  ;;  %v1673_v60 = vrot.slane %v1672_v57, 1  ;;  %v1676_v61 = vmax.f32 %v2239_v41, %v1675_v31  ;;  %v1681_v62 = vrot.slane %v2240_v43, 4 }
 0x181   : > { %v1803_v63 = vmax.f32 %v1802_v52, %v1668_v59  ;;  %v1674_v0 = vmax.f32 %v1672_v57, %v1673_v60  ;;  %v1677_v1 = vrot.slane %v1676_v61, 2  ;;  %v1682_v2 = vmax.f32 %v2240_v43, %v1681_v62 }
 0x182   : > { %v1500_v3 = vpop.f32.mrb[28].mxu0 }
 0x183   : > { %v1804_v4 = vmax.f32 %v1803_v63, %v1674_v0  ;;  %v1678_v5 = vmax.f32 %v1676_v61, %v1677_v1  ;;  %v1683_v45 = vrot.slane %v1682_v2, 2  ;;  %v2241_v6 = vadd.f32 %v1500_v3, %v3004_v49  ;;  %v1502_v33 = vpop.f32.mrb[29].mxu0 }
 0x184   : > { %v1503_v7 = vpop.f32.mrb[30].mxu0 }
 0x185   : > { %v1679_v8 = vrot.slane %v1678_v5, 1  ;;  %v1684_v9 = vmax.f32 %v1682_v2, %v1683_v45  ;;  %v1687_v47 = vrot.slane %v2241_v6, 4  ;;  %v2242_v10 = vadd.f32 %v1503_v7, %v3006_v51  ;;  %v1505_v11 = vpop.f32.mrb[31].mxu0 }
 0x187   : > { %v1680_v35 = vmax.f32 %v1678_v5, %v1679_v8  ;;  %v1685_v12 = vrot.slane %v1684_v9, 1  ;;  %v1688_v13 = vmax.f32 %v2241_v6, %v1687_v47  ;;  %v1693_v14 = vrot.slane %v2242_v10, 4 }
 0x189   : > { %v1805_v15 = vmax.f32 %v1804_v4, %v1680_v35  ;;  %v1686_v16 = vmax.f32 %v1684_v9, %v1685_v12  ;;  %v1689_v17 = vrot.slane %v1688_v13, 2  ;;  %v1694_v20 = vmax.f32 %v2242_v10, %v1693_v14  ;;  %v1042_v21 = vpop.f32.mrb[32].mxu1 }
 0x18a   : > { %v1508_v22 = vpop.f32.mrb[32].mxu0  ;;  %v1044_v23 = vpop.f32.mrb[33].mxu1 }
 0x18b   : > { %v1806_v49 = vmax.f32 %v1805_v15, %v1686_v16  ;;  %v1690_v24 = vmax.f32 %v1688_v13, %v1689_v17  ;;  %v1695_v25 = vrot.slane %v1694_v20, 2  ;;  %v2243_v39 = vadd.f32 %v1508_v22, %v1042_v21  ;;  %v1510_v26 = vpop.f32.mrb[33].mxu0  ;;  %v1045_v28 = vpop.f32.mrb[34].mxu1 }
 0x18c   : > { %v1511_v30 = vpop.f32.mrb[34].mxu0  ;;  %v1047_v51 = vpop.f32.mrb[35].mxu1 }
 0x18d   : > { %v1691_v27 = vrot.slane %v1690_v24, 1  ;;  %v1696_v32 = vmax.f32 %v1694_v20, %v1695_v25  ;;  %v1699_v34 = vrot.slane %v2243_v39, 4  ;;  %v2244_v36 = vadd.f32 %v1511_v30, %v1045_v28  ;;  %v1513_v38 = vpop.f32.mrb[35].mxu0 }
 0x18f   : > { %v1692_v40 = vmax.f32 %v1690_v24, %v1691_v27  ;;  %v1697_v42 = vrot.slane %v1696_v32, 1  ;;  %v1700_v44 = vmax.f32 %v2243_v39, %v1699_v34  ;;  %v1705_v46 = vrot.slane %v2244_v36, 4 }
 0x191   : > { %v1807_v48 = vmax.f32 %v1806_v49, %v1692_v40  ;;  %v1698_v50 = vmax.f32 %v1696_v32, %v1697_v42  ;;  %v1701_v52 = vrot.slane %v1700_v44, 2  ;;  %v1706_v53 = vmax.f32 %v2244_v36, %v1705_v46  ;;  %v1050_v29 = vpop.f32.mrb[36].mxu1 }
 0x192   : > { %v1516_v41 = vpop.f32.mrb[36].mxu0  ;;  %v1052_v54 = vpop.f32.mrb[37].mxu1 }
 0x193   : > { %v3024_v55 = vmax.f32 %v1807_v48, %v1698_v50  ;;  %v1702_v56 = vmax.f32 %v1700_v44, %v1701_v52  ;;  %v1707_v57 = vrot.slane %v1706_v53, 2  ;;  %v2245_v31 = vadd.f32 %v1516_v41, %v1050_v29  ;;  %v1518_v43 = vpop.f32.mrb[37].mxu0  ;;  %v1053_v58 = vpop.f32.mrb[38].mxu1 }
 0x194   : > { %v1519_v59 = vpop.f32.mrb[38].mxu0  ;;  %v1055_v60 = vpop.f32.mrb[39].mxu1 }
 0x195   : > { %v3030_v61 = vmax.f32 %v1801_v37, %v3024_v55  ;;  %v1703_v62 = vrot.slane %v1702_v56, 1  ;;  %v1708_v63 = vmax.f32 %v1706_v53, %v1707_v57  ;;  %v1711_v0 = vrot.slane %v2245_v31, 4  ;;  %v1521_v1 = vpop.f32.mrb[39].mxu0 }
 0x196   : > { %v2246_v2 = vadd.f32 %v1519_v59, %v1053_v58 }
 0x197   : > { %v1709_v3 = vrot.slane %v1708_v63, 1  ;;  %v1712_v4 = vmax.f32 %v2245_v31, %v1711_v0  ;;  %v1704_v45 = vmax.f32 %v1702_v56, %v1703_v62 }
 0x198   : > { %v1717_v5 = vrot.slane %v2246_v2, 4 }
 0x199   : > { %v1710_v6 = vmax.f32 %v1708_v63, %v1709_v3  ;;  %v1713_v33 = vrot.slane %v1712_v4, 2  ;;  %v1058_v7 = vpop.f32.mrb[40].mxu1 }
 0x19a   : > { %v1718_v8 = vmax.f32 %v2246_v2, %v1717_v5  ;;  %v1524_v9 = vpop.f32.mrb[40].mxu0  ;;  %v1060_v47 = vpop.f32.mrb[41].mxu1 }
 0x19b   : > { %v1809_v10 = vmax.f32 %v1704_v45, %v1710_v6  ;;  %v1714_v11 = vmax.f32 %v1712_v4, %v1713_v33  ;;  %v2247_v18 = vadd.f32 %v1524_v9, %v1058_v7  ;;  %v1526_v19 = vpop.f32.mrb[41].mxu0  ;;  %v1061_v37 = vpop.f32.mrb[42].mxu1 }
 0x19c   : > { %v1719_v35 = vrot.slane %v1718_v8, 2  ;;  %v1527_v12 = vpop.f32.mrb[42].mxu0  ;;  %v1063_v13 = vpop.f32.mrb[43].mxu1 }
 0x19d   : > { %v1715_v14 = vrot.slane %v1714_v11, 1  ;;  %v1723_v15 = vrot.slane %v2247_v18, 4  ;;  %v2248_v16 = vadd.f32 %v1527_v12, %v1061_v37  ;;  %v1529_v17 = vpop.f32.mrb[43].mxu0 }
 0x19e   : > { %v1720_v20 = vmax.f32 %v1718_v8, %v1719_v35 }
 0x19f   : > { %v1716_v21 = vmax.f32 %v1714_v11, %v1715_v14  ;;  %v1724_v22 = vmax.f32 %v2247_v18, %v1723_v15  ;;  %v1729_v23 = vrot.slane %v2248_v16, 4 }
 0x1a0   : > { %v1721_v49 = vrot.slane %v1720_v20, 1 }
 0x1a1   : > { %v1810_v24 = vmax.f32 %v1809_v10, %v1716_v21  ;;  %v1725_v25 = vrot.slane %v1724_v22, 2  ;;  %v1730_v39 = vmax.f32 %v2248_v16, %v1729_v23  ;;  %v1066_v26 = vpop.f32.mrb[44].mxu1 }
 0x1a2   : > { %v1722_v28 = vmax.f32 %v1720_v20, %v1721_v49  ;;  %v1532_v30 = vpop.f32.mrb[44].mxu0  ;;  %v1068_v51 = vpop.f32.mrb[45].mxu1 }
 0x1a3   : > { %v1726_v27 = vmax.f32 %v1724_v22, %v1725_v25  ;;  %v1731_v32 = vrot.slane %v1730_v39, 2  ;;  %v2249_v34 = vadd.f32 %v1532_v30, %v1066_v26  ;;  %v1534_v36 = vpop.f32.mrb[45].mxu0  ;;  %v1069_v38 = vpop.f32.mrb[46].mxu1  ;;  %v3037_v25 = vld [vmem:[%s3104_s2] sm:$0x1] }
 0x1a4   : > { %v1811_v40 = vmax.f32 %v1810_v24, %v1722_v28  ;;  %v1535_v42 = vpop.f32.mrb[46].mxu0  ;;  %v1071_v44 = vpop.f32.mrb[47].mxu1 }
 0x1a5   : > { %v1727_v46 = vrot.slane %v1726_v27, 1  ;;  %v1732_v48 = vmax.f32 %v1730_v39, %v1731_v32  ;;  %v1735_v50 = vrot.slane %v2249_v34, 4  ;;  %v2250_v52 = vadd.f32 %v1535_v42, %v1069_v38  ;;  %v1537_v53 = vpop.f32.mrb[47].mxu0 }
 0x1a7   : > { %v1728_v29 = vmax.f32 %v1726_v27, %v1727_v46  ;;  %v1733_v41 = vrot.slane %v1732_v48, 1  ;;  %v1736_v54 = vmax.f32 %v2249_v34, %v1735_v50  ;;  %v1741_v56 = vrot.slane %v2250_v52, 4 }
 0x1a9   : > { %v1812_v57 = vmax.f32 %v1811_v40, %v1728_v29  ;;  %v1734_v31 = vmax.f32 %v1732_v48, %v1733_v41  ;;  %v1737_v43 = vrot.slane %v1736_v54, 2  ;;  %v1742_v58 = vmax.f32 %v2250_v52, %v1741_v56  ;;  %v1074_v59 = vpop.f32.mrb[48].mxu1 }
 0x1aa   : > { %v1540_v60 = vpop.f32.mrb[48].mxu0  ;;  %v1076_v62 = vpop.f32.mrb[49].mxu1  ;;  %v1829_v40 = vadd.f32 %v3037_v25, %v3030_v61 }
 0x1ab   : > { %v1813_v63 = vmax.f32 %v1812_v57, %v1734_v31  ;;  %v1738_v0 = vmax.f32 %v1736_v54, %v1737_v43  ;;  %v1743_v1 = vrot.slane %v1742_v58, 2  ;;  %v2251_v2 = vadd.f32 %v1540_v60, %v1074_v59  ;;  %v1542_v3 = vpop.f32.mrb[49].mxu0  ;;  %v1077_v4 = vpop.f32.mrb[50].mxu1 }
 0x1ac   : > { %v1543_v5 = vpop.f32.mrb[50].mxu0  ;;  %v1079_v45 = vpop.f32.mrb[51].mxu1 }
 0x1ad   : > { %v1739_v6 = vrot.slane %v1738_v0, 1  ;;  %v1744_v33 = vmax.f32 %v1742_v58, %v1743_v1  ;;  %v1747_v7 = vrot.slane %v2251_v2, 4  ;;  %v2252_v8 = vadd.f32 %v1543_v5, %v1077_v4  ;;  %v1545_v9 = vpop.f32.mrb[51].mxu0 }
 0x1af   : > { %v1740_v47 = vmax.f32 %v1738_v0, %v1739_v6  ;;  %v1745_v10 = vrot.slane %v1744_v33, 1  ;;  %v1748_v11 = vmax.f32 %v2251_v2, %v1747_v7  ;;  %v1753_v18 = vrot.slane %v2252_v8, 4 }
 0x1b1   : > { %v1814_v19 = vmax.f32 %v1813_v63, %v1740_v47  ;;  %v1746_v37 = vmax.f32 %v1744_v33, %v1745_v10  ;;  %v1749_v35 = vrot.slane %v1748_v11, 2  ;;  %v1754_v12 = vmax.f32 %v2252_v8, %v1753_v18  ;;  %v1082_v13 = vpop.f32.mrb[52].mxu1 }
 0x1b2   : > { %v1548_v14 = vpop.f32.mrb[52].mxu0  ;;  %v1084_v15 = vpop.f32.mrb[53].mxu1 }
 0x1b3   : > { %v3032_v16 = vmax.f32 %v1814_v19, %v1746_v37  ;;  %v1750_v17 = vmax.f32 %v1748_v11, %v1749_v35  ;;  %v1755_v20 = vrot.slane %v1754_v12, 2  ;;  %v2253_v21 = vadd.f32 %v1548_v14, %v1082_v13  ;;  %v1550_v22 = vpop.f32.mrb[53].mxu0  ;;  %v1085_v23 = vpop.f32.mrb[54].mxu1 }
 0x1b4   : > { %v1551_v49 = vpop.f32.mrb[54].mxu0  ;;  %v1087_v24 = vpop.f32.mrb[55].mxu1 }
 0x1b5   : > { %v1825_v39 = vmax.f32 %v3030_v61, %v3032_v16  ;;  %v1751_v26 = vrot.slane %v1750_v17, 1  ;;  %v1756_v28 = vmax.f32 %v1754_v12, %v1755_v20  ;;  %v1759_v30 = vrot.slane %v2253_v21, 4  ;;  %v1553_v51 = vpop.f32.mrb[55].mxu0 }
 0x1b6   : > { %v2254_v27 = vadd.f32 %v1551_v49, %v1085_v23  ;;  %v1824_v32 = vmax.f32 %v3024_v55, %v3032_v16 }
 0x1b7   : > { %v1757_v34 = vrot.slane %v1756_v28, 1  ;;  %v1760_v36 = vmax.f32 %v2253_v21, %v1759_v30  ;;  %v1830_v38 = vadd.f32 %v3037_v25, %v1825_v39  ;;  %v1752_v44 = vmax.f32 %v1750_v17, %v1751_v26 }
 0x1b8   : > { %v1765_v42 = vrot.slane %v2254_v27, 4 }
 0x1b9   : > { %v1758_v46 = vmax.f32 %v1756_v28, %v1757_v34  ;;  %v1761_v48 = vrot.slane %v1760_v36, 2  ;;  %v1090_v50 = vpop.f32.mrb[56].mxu1  ;;  %v1837_v52 = vrot.slane %v1830_v38, 7 }
 0x1ba   : > { %v1766_v53 = vmax.f32 %v2254_v27, %v1765_v42  ;;  %v1556_v29 = vpop.f32.mrb[56].mxu0  ;;  %v1092_v41 = vpop.f32.mrb[57].mxu1 }
 0x1bb   : > { %v1816_v54 = vmax.f32 %v1752_v44, %v1758_v46  ;;  %v1762_v56 = vmax.f32 %v1760_v36, %v1761_v48  ;;  %v2255_v57 = vadd.f32 %v1556_v29, %v1090_v50  ;;  %v1558_v31 = vpop.f32.mrb[57].mxu0  ;;  %v1093_v43 = vpop.f32.mrb[58].mxu1  ;;  %v3046_v58 = vsel %vm1838_vm3, %v1837_v52, %v1829_v40 }
 0x1bc   : > { %v1767_v59 = vrot.slane %v1766_v53, 2  ;;  %v1559_v60 = vpop.f32.mrb[58].mxu0  ;;  %v1095_v61 = vpop.f32.mrb[59].mxu1 }
 0x1bd   : > { %v1763_v62 = vrot.slane %v1762_v56, 1  ;;  %v1771_v63 = vrot.slane %v2255_v57, 4  ;;  %v2256_v0 = vadd.f32 %v1559_v60, %v1093_v43  ;;  %v1561_v1 = vpop.f32.mrb[59].mxu0 }
 0x1be   : > { %v1768_v2 = vmax.f32 %v1766_v53, %v1767_v59 }
 0x1bf   : > { %v1764_v3 = vmax.f32 %v1762_v56, %v1763_v62  ;;  %v1772_v4 = vmax.f32 %v2255_v57, %v1771_v63  ;;  %v1777_v5 = vrot.slane %v2256_v0, 4 }
 0x1c0   : > { %v1769_v45 = vrot.slane %v1768_v2, 1 }
 0x1c1   : > { %v1817_v6 = vmax.f32 %v1816_v54, %v1764_v3  ;;  %v1773_v33 = vrot.slane %v1772_v4, 2  ;;  %v1778_v7 = vmax.f32 %v2256_v0, %v1777_v5  ;;  %v1098_v8 = vpop.f32.mrb[60].mxu1 }
 0x1c2   : > { %v1770_v9 = vmax.f32 %v1768_v2, %v1769_v45  ;;  %v1564_v47 = vpop.f32.mrb[60].mxu0  ;;  %v1100_v10 = vpop.f32.mrb[61].mxu1 }
 0x1c3   : > { %v1774_v11 = vmax.f32 %v1772_v4, %v1773_v33  ;;  %v1779_v18 = vrot.slane %v1778_v7, 2  ;;  %v2257_v19 = vadd.f32 %v1564_v47, %v1098_v8  ;;  %v1566_v37 = vpop.f32.mrb[61].mxu0  ;;  %v1101_v35 = vpop.f32.mrb[62].mxu1 }
 0x1c4   : > { %v1818_v12 = vmax.f32 %v1817_v6, %v1770_v9  ;;  %v1567_v13 = vpop.f32.mrb[62].mxu0  ;;  %v1103_v14 = vpop.f32.mrb[63].mxu1 }
 0x1c5   : > { %v1775_v15 = vrot.slane %v1774_v11, 1  ;;  %v1780_v17 = vmax.f32 %v1778_v7, %v1779_v18  ;;  %v1783_v20 = vrot.slane %v2257_v19, 4  ;;  %v2258_v21 = vadd.f32 %v1567_v13, %v1101_v35  ;;  %v1569_v22 = vpop.f32.mrb[63].mxu0 }
 0x1c7   : > { %v1776_v23 = vmax.f32 %v1774_v11, %v1775_v15  ;;  %v1781_v49 = vrot.slane %v1780_v17, 1  ;;  %v1784_v24 = vmax.f32 %v2257_v19, %v1783_v20  ;;  %v1789_v39 = vrot.slane %v2258_v21, 4 }
 0x1c9   : > { %v1819_v26 = vmax.f32 %v1818_v12, %v1776_v23  ;;  %v1782_v28 = vmax.f32 %v1780_v17, %v1781_v49  ;;  %v1785_v30 = vrot.slane %v1784_v24, 2  ;;  %v1790_v51 = vmax.f32 %v2258_v21, %v1789_v39 }
 0x1cb   : > { %v1820_v27 = vmax.f32 %v1819_v26, %v1782_v28  ;;  %v1786_v34 = vmax.f32 %v1784_v24, %v1785_v30  ;;  %v1791_v36 = vrot.slane %v1790_v51, 2 }
 0x1cd   : > { %v1787_v38 = vrot.slane %v1786_v34, 1  ;;  %v1792_v40 = vmax.f32 %v1790_v51, %v1791_v36 }
 0x1cf   : > { %v1788_v42 = vmax.f32 %v1786_v34, %v1787_v38  ;;  %v1793_v44 = vrot.slane %v1792_v40, 1 }
 0x1d1   : > { %v1821_v46 = vmax.f32 %v1820_v27, %v1788_v42  ;;  %v1794_v48 = vmax.f32 %v1792_v40, %v1793_v44 }
 0x1d3   : > { %v1822_v50 = vmax.f32 %v1821_v46, %v1794_v48 }
 0x1d5   : > { %v1826_v52 = vmax.f32 %v1824_v32, %v1822_v50  ;;  %v1827_v53 = vmax.f32 %v3032_v16, %v1822_v50 }
 0x1d7   : > { %v1831_v29 = vadd.f32 %v3037_v25, %v1826_v52  ;;  %v1832_v41 = vadd.f32 %v3037_v25, %v1827_v53 }
 0x1d9   : > { %v1840_v54 = vrot.slane %v1831_v29, 6  ;;  %v1843_v56 = vrot.slane %v1832_v41, 5 }
 0x1db   : > { %v1842_v57 = vsel %vm1841_vm4, %v1840_v54, %v3046_v58 }
 0x1dc   : > { %v1845_v55 = vsel %vm1844_vm5, %v1843_v56, %v1842_v57 }
 0x1dd   : > { %1847 = vst [vmem:[%s163_s20] sm:$0xf] %v1845_v55 }
 0x1de   : > { %2480 = shalt.err (!%p2477_p3)
}
 0x1df   : > { %s2481_s6 = scalar_lea.hbm %s3060_s27, 64  ;;  %s2485_s9 = scalar_lea.hbm %s3105_s3, 128 }
 0x1e0   : > { %p2482_p4 = scmp.ne.s32.totalorder %s3060_s27, %s2481_s6  ;;  %p2486_p9 = scmp.lt.u32.totalorder %s3060_s27, %s3105_s3 }
 0x1e1   : > { %p2487_p10 = scmp.lt.u32.totalorder %s2485_s9, %s2481_s6  ;;  %p2489_p12 = scmp.lt.u32.totalorder %s2481_s6, %s3060_s27 }
 0x1e2   : > { %p2483_p7 = pnand %p2482_p4, %p2592_p5 }
 0x1e3   : > { %p2488_p11 = por %p2487_p10, %p2486_p9 }
 0x1e4   : > { %p2484_p8 = pneg %p2483_p7 }
 0x1e5   : > { %p2490_p13 = por %p2489_p12, %p2488_p11 }
 0x1e7   : > { %p2491_p0 = pnand %p2490_p13, %p2484_p8 }
 0x1e9   : > { %2494 = shalt.err (!%p2491_p0)
}
 0x1ea   : > { %2324 = dma.vmem_to_hbm [thread:$0]  (%p2592_p5), %s3062_s24, 64, %s3060_s27, %s1849_s16  }
 0x1eb PF: > { %p2330_p1 = scmp.ge.s32.totalorder %s2529_s15, 2  ;;  %s1874_s11 = sand.u32 1, %s2517_s12  }
 0x1ec   : > { %s1875_s17 = scalar_lea.sflag [#allocation3], %s1874_s11 }
 0x1ed   : > { %p2327_p2 = pnand %p2330_p1, %p2596_p6 }
 0x1ef   : > { %2512 = dma.done.wait (!%p2327_p2), %s1875_s17, 64  }
 0x1f0   : > { %2514 = vsyncadd (!%p2327_p2), %s1875_s17, 4294967232  ;;  %p13_p3 = scmp.ge.s32.totalorder %s2579_s18, 4   ;;  %s3108_s12 = smov %s2521_s13 }
 0x1f1   : > { %s3109_s13 = smov %s2525_s14  ;;  %s3110_s14 = smov %s2590_s21 }
 0x1f2   : > { %s3111_s15 = smov %s2579_s18  ;;  %15 = sbr.rel (!%p13_p3) target bundleno = 3 (0x3), region = 71 }
 0x1f9   :  { %1880 = vsyncpa [#allocation3], 1 }
 0x1fa   :  { %1882 = vsyncpa [#allocation3 + $0x1], 1 }

</bundles_post_ra>
